<compile_context>
chip_gen: v7x
topology: tpu7x:2x2x1
jax: 0.10.0
libtpu: 0.0.40
codegen_flags: <defaults>
</compile_context>

<pallas_src>
import functools

import jax
import jax.numpy as jnp
import numpy as np
from jax import lax
from jax.experimental import pallas as pl
from jax.experimental.pallas import tpu as pltpu

_LANE = 128


def _dice_kernel(x_ref, t_ref, out_ref, acc_num, acc_den, *,
                 m_total, tile_r, smooth, needs_mask):
    step = pl.program_id(0)

    @pl.when(step == 0)
    def _init():
        acc_num[...] = jnp.zeros_like(acc_num)
        acc_den[...] = jnp.zeros_like(acc_den)

    xv = x_ref[...].astype(jnp.float32)          # (tile_r, 128)
    tv = t_ref[...].astype(jnp.float32)

    if needs_mask:
        # Global element ids for tail masking (pad / out-of-range block
        # elements must not contribute: sigmoid(0) = 0.5 would corrupt
        # sum(p)).
        rows = lax.broadcasted_iota(jnp.int32, (tile_r, _LANE), 0)
        cols = lax.broadcasted_iota(jnp.int32, (tile_r, _LANE), 1)
        flat = (step * tile_r + rows) * _LANE + cols
        mask = flat < m_total
        xv = jnp.where(mask, xv, 0.0)
        tv = jnp.where(mask, tv, 0.0)
        sv = jnp.where(mask, 1.0 / (1.0 + jnp.exp(-xv)), 0.0)
    else:
        sv = 1.0 / (1.0 + jnp.exp(-xv))

    # Sublane-reduce each tile to (1, 128) lane-partials and accumulate.
    acc_num[...] += jnp.sum(sv * tv, axis=0, keepdims=True)
    acc_den[...] += jnp.sum(sv + tv, axis=0, keepdims=True)

    @pl.when(step == pl.num_programs(0) - 1)
    def _finalize():
        inter = jnp.sum(acc_num[...], axis=1, keepdims=True)   # (1, 1)
        denom = jnp.sum(acc_den[...], axis=1, keepdims=True)
        dice = (2.0 * inter + smooth) / (denom + smooth)
        out_ref[...] = 1.0 - dice


def dice_loss(inputs, targets, smooth=1.0, tile_rows=4096):
    """Pallas TPU DiceLoss.  inputs: logits, targets: same shape.  Returns scalar."""
    x = inputs.reshape(-1)
    t = targets.reshape(-1)
    m = x.shape[0]

    # Pad flat length to a multiple of 128 only when required (the reshape
    # below is otherwise a free, layout-preserving view).
    m_pad = ((m + _LANE - 1) // _LANE) * _LANE
    if m_pad != m:
        x = jnp.pad(x, (0, m_pad - m))
        t = jnp.pad(t, (0, m_pad - m))
    rows = m_pad // _LANE
    x2 = x.reshape(rows, _LANE)
    t2 = t.reshape(rows, _LANE)

    tile_rows = max(8, (tile_rows // 8) * 8)
    tile_r = rows if rows <= tile_rows else tile_rows
    grid = (pl.cdiv(rows, tile_r),)
    needs_mask = (m_pad != m) or (rows % tile_r != 0)

    itemsize = jnp.dtype(inputs.dtype).itemsize + jnp.dtype(targets.dtype).itemsize

    kernel = functools.partial(
        _dice_kernel,
        m_total=m, tile_r=tile_r,
        smooth=float(smooth), needs_mask=needs_mask)

    out = pl.pallas_call(
        kernel,
        out_shape=jax.ShapeDtypeStruct((1, 1), jnp.float32),
        grid_spec=pltpu.PrefetchScalarGridSpec(
            num_scalar_prefetch=0,
            grid=grid,
            in_specs=[
                pl.BlockSpec((tile_r, _LANE), lambda i: (i, 0)),   # logits tile
                pl.BlockSpec((tile_r, _LANE), lambda i: (i, 0)),   # targets tile
            ],
            out_specs=pl.BlockSpec((1, 1), lambda i: (0, 0)),      # scalar loss
            scratch_shapes=[
                pltpu.VMEM((1, _LANE), jnp.float32),   # acc sum(sigmoid(x) * t)
                pltpu.VMEM((1, _LANE), jnp.float32),   # acc sum(sigmoid(x)) + sum(t)
            ],
        ),
        compiler_params=pltpu.CompilerParams(
            dimension_semantics=("arbitrary",)),       # reduction axis (accumulator)
        cost_estimate=pl.CostEstimate(
            flops=6 * m, transcendentals=m, bytes_accessed=m * itemsize + 4),
    )(x2, t2)

    return out[0, 0]


def _reference(inputs, targets, smooth=1.0):
    p = 1.0 / (1.0 + jnp.exp(-inputs.astype(jnp.float32)))
    t = targets.astype(jnp.float32)
    inter = jnp.sum(p * t)
    dice = (2.0 * inter + smooth) / (jnp.sum(p) + jnp.sum(t) + smooth)
    return 1.0 - dice


if __name__ == "__main__":
    key = jax.random.PRNGKey(0)
    k1, k2, k3, k4 = jax.random.split(key, 4)

    # Segmentation-style shapes: logits and binary targets (N, 1, H, W).
    N, C, H, W = 2, 1, 16, 16
    logits = jax.random.normal(k1, (N, C, H, W), dtype=jnp.float32)
    targets = (jax.random.uniform(k2, (N, C, H, W)) > 0.5).astype(jnp.float32)

    loss = dice_loss(logits, targets, smooth=1.0)
    jax.block_until_ready(loss)
    loss_ref = _reference(logits, targets, smooth=1.0)
    np.testing.assert_allclose(np.asarray(loss), np.asarray(loss_ref),
                               rtol=1e-5, atol=1e-5)

    # Non-128-aligned shape exercises the pad + in-kernel mask path.
    logits2 = jax.random.normal(k3, (3, 1, 7, 9), dtype=jnp.float32)
    targets2 = (jax.random.uniform(k4, (3, 1, 7, 9)) > 0.5).astype(jnp.float32)
    loss2 = dice_loss(logits2, targets2, smooth=1.0)
    jax.block_until_ready(loss2)
    loss2_ref = _reference(logits2, targets2, smooth=1.0)
    np.testing.assert_allclose(np.asarray(loss2), np.asarray(loss2_ref),
                               rtol=1e-5, atol=1e-5)

    assert np.asarray(loss).shape == ()
    print("KERNEL_OK")
</pallas_src>

<mosaic_0001>
module attributes {stable_mosaic.version = 11 : i64} {
  func.func @_dice_kernel(%arg0: i32, %arg1: memref<4x128xf32, #tpu.memory_space<vmem>>, %arg2: memref<4x128xf32, #tpu.memory_space<vmem>>, %arg3: memref<1x1xf32, #tpu.memory_space<vmem>>, %arg4: memref<1x128xf32, #tpu.memory_space<vmem>>, %arg5: memref<1x128xf32, #tpu.memory_space<vmem>>) attributes {dimension_semantics = [#tpu.dimension_semantics<arbitrary>], iteration_bounds = array<i64: 1>, scalar_prefetch = 0 : i64, scratch_operands = 2 : i64, tpu.core_type = #tpu.core_type<tc>, window_params = [{transform_indices = @transform_0, window_bounds = array<i64: 4, 128>}, {transform_indices = @transform_1, window_bounds = array<i64: 4, 128>}, {pipeline_mode = #tpu.pipeline_mode<synchronous>, transform_indices = @transform_2, window_bounds = array<i64: 1, 1>}]} {
    %c0_i32 = arith.constant 0 : i32
    %0 = arith.cmpi eq, %arg0, %c0_i32 : i32
    %1 = arith.extui %0 : i1 to i32
    %c0_i32_0 = arith.constant 0 : i32
    %2 = arith.cmpi ne, %1, %c0_i32_0 : i32
    scf.if %2 {
      %cst_18 = arith.constant 0.000000e+00 : f32
      %27 = vector.broadcast %cst_18 : f32 to vector<1x128xf32>
      %c0_19 = arith.constant 0 : index
      %c0_20 = arith.constant 0 : index
      %28 = vector.load %arg4[%c0_19, %c0_20] : memref<1x128xf32, #tpu.memory_space<vmem>>, vector<1x128xf32>
      tpu.vector_store %arg4[%c0_19, %c0_20], %27 {strides = array<i32>} : memref<1x128xf32, #tpu.memory_space<vmem>>, vector<1x128xf32>,
      %cst_21 = arith.constant 0.000000e+00 : f32
      %29 = vector.broadcast %cst_21 : f32 to vector<1x128xf32>
      %c0_22 = arith.constant 0 : index
      %c0_23 = arith.constant 0 : index
      %30 = vector.load %arg5[%c0_22, %c0_23] : memref<1x128xf32, #tpu.memory_space<vmem>>, vector<1x128xf32>
      tpu.vector_store %arg5[%c0_22, %c0_23], %29 {strides = array<i32>} : memref<1x128xf32, #tpu.memory_space<vmem>>, vector<1x128xf32>,
    } else {
    }
    %c0 = arith.constant 0 : index
    %c0_1 = arith.constant 0 : index
    %3 = vector.load %arg1[%c0, %c0_1] : memref<4x128xf32, #tpu.memory_space<vmem>>, vector<4x128xf32>
    %c0_2 = arith.constant 0 : index
    %c0_3 = arith.constant 0 : index
    %4 = vector.load %arg2[%c0_2, %c0_3] : memref<4x128xf32, #tpu.memory_space<vmem>>, vector<4x128xf32>
    %cst = arith.constant 0.000000e+00 : f32
    %5 = vector.broadcast %cst : f32 to vector<4x128xf32>
    %6 = arith.subf %5, %3 : vector<4x128xf32>
    %7 = math.exp %6 : vector<4x128xf32>
    %cst_4 = arith.constant 1.000000e+00 : f32
    %8 = vector.broadcast %cst_4 : f32 to vector<4x128xf32>
    %9 = arith.addf %8, %7 : vector<4x128xf32>
    %cst_5 = arith.constant 1.000000e+00 : f32
    %10 = vector.broadcast %cst_5 : f32 to vector<4x128xf32>
    %11 = arith.divf %10, %9 : vector<4x128xf32>
    %c0_6 = arith.constant 0 : index
    %c0_7 = arith.constant 0 : index
    %12 = vector.load %arg4[%c0_6, %c0_7] : memref<1x128xf32, #tpu.memory_space<vmem>>, vector<1x128xf32>
    %13 = arith.mulf %11, %4 : vector<4x128xf32>
    %cst_8 = arith.constant dense<0.000000e+00> : vector<128xf32>
    %14 = vector.multi_reduction <add>, %13, %cst_8 [0] : vector<4x128xf32> to vector<128xf32>
    %15 = vector.shape_cast %14 : vector<128xf32> to vector<1x128xf32>
    %16 = arith.addf %12, %15 : vector<1x128xf32>
    %c0_9 = arith.constant 0 : index
    %c0_10 = arith.constant 0 : index
    %17 = vector.load %arg4[%c0_9, %c0_10] : memref<1x128xf32, #tpu.memory_space<vmem>>, vector<1x128xf32>
    tpu.vector_store %arg4[%c0_9, %c0_10], %16 {strides = array<i32>} : memref<1x128xf32, #tpu.memory_space<vmem>>, vector<1x128xf32>,
    %c0_11 = arith.constant 0 : index
    %c0_12 = arith.constant 0 : index
    %18 = vector.load %arg5[%c0_11, %c0_12] : memref<1x128xf32, #tpu.memory_space<vmem>>, vector<1x128xf32>
    %19 = arith.addf %11, %4 : vector<4x128xf32>
    %cst_13 = arith.constant dense<0.000000e+00> : vector<128xf32>
    %20 = vector.multi_reduction <add>, %19, %cst_13 [0] : vector<4x128xf32> to vector<128xf32>
    %21 = vector.shape_cast %20 : vector<128xf32> to vector<1x128xf32>
    %22 = arith.addf %18, %21 : vector<1x128xf32>
    %c0_14 = arith.constant 0 : index
    %c0_15 = arith.constant 0 : index
    %23 = vector.load %arg5[%c0_14, %c0_15] : memref<1x128xf32, #tpu.memory_space<vmem>>, vector<1x128xf32>
    tpu.vector_store %arg5[%c0_14, %c0_15], %22 {strides = array<i32>} : memref<1x128xf32, #tpu.memory_space<vmem>>, vector<1x128xf32>,
    %c0_i32_16 = arith.constant 0 : i32
    %24 = arith.cmpi eq, %arg0, %c0_i32_16 : i32
    %25 = arith.extui %24 : i1 to i32
    %c0_i32_17 = arith.constant 0 : i32
    %26 = arith.cmpi ne, %25, %c0_i32_17 : i32
    scf.if %26 {
      %c0_18 = arith.constant 0 : index
      %c0_19 = arith.constant 0 : index
      %27 = vector.load %arg4[%c0_18, %c0_19] : memref<1x128xf32, #tpu.memory_space<vmem>>, vector<1x128xf32>
      %cst_20 = arith.constant dense<0.000000e+00> : vector<1xf32>
      %28 = vector.multi_reduction <add>, %27, %cst_20 [1] : vector<1x128xf32> to vector<1xf32>
      %29 = vector.shape_cast %28 : vector<1xf32> to vector<1x1xf32>
      %c0_21 = arith.constant 0 : index
      %c0_22 = arith.constant 0 : index
      %30 = vector.load %arg5[%c0_21, %c0_22] : memref<1x128xf32, #tpu.memory_space<vmem>>, vector<1x128xf32>
      %cst_23 = arith.constant dense<0.000000e+00> : vector<1xf32>
      %31 = vector.multi_reduction <add>, %30, %cst_23 [1] : vector<1x128xf32> to vector<1xf32>
      %32 = vector.shape_cast %31 : vector<1xf32> to vector<1x1xf32>
      %cst_24 = arith.constant 2.000000e+00 : f32
      %33 = vector.broadcast %cst_24 : f32 to vector<1x1xf32>
      %34 = arith.mulf %33, %29 : vector<1x1xf32>
      %cst_25 = arith.constant 1.000000e+00 : f32
      %35 = vector.broadcast %cst_25 : f32 to vector<1x1xf32>
      %36 = arith.addf %34, %35 : vector<1x1xf32>
      %cst_26 = arith.constant 1.000000e+00 : f32
      %37 = vector.broadcast %cst_26 : f32 to vector<1x1xf32>
      %38 = arith.addf %32, %37 : vector<1x1xf32>
      %39 = arith.divf %36, %38 : vector<1x1xf32>
      %cst_27 = arith.constant 1.000000e+00 : f32
      %40 = vector.broadcast %cst_27 : f32 to vector<1x1xf32>
      %41 = arith.subf %40, %39 : vector<1x1xf32>
      %c0_28 = arith.constant 0 : index
      %c0_29 = arith.constant 0 : index
      %42 = vector.load %arg3[%c0_28, %c0_29] : memref<1x1xf32, #tpu.memory_space<vmem>>, vector<1x1xf32>
      tpu.vector_store %arg3[%c0_28, %c0_29], %41 {strides = array<i32>} : memref<1x1xf32, #tpu.memory_space<vmem>>, vector<1x1xf32>,
    } else {
    }
    return
  }
  func.func @transform_0(%arg0: i32) -> (i32, i32) {
    %c0_i32 = arith.constant 0 : i32
    %c0_i32_0 = arith.constant 0 : i32
    return %arg0, %c0_i32 : i32, i32
  }
  func.func @transform_1(%arg0: i32) -> (i32, i32) {
    %c0_i32 = arith.constant 0 : i32
    %c0_i32_0 = arith.constant 0 : i32
    return %arg0, %c0_i32 : i32, i32
  }
  func.func @transform_2(%arg0: i32) -> (i32, i32) {
    %c0_i32 = arith.constant 0 : i32
    %c0_i32_0 = arith.constant 0 : i32
    %c0_i32_1 = arith.constant 0 : i32
    return %c0_i32, %c0_i32_0 : i32, i32
  }
}

</mosaic_0001>

<bundles_post_ra>
// kernel: tpu_custom_call.1
= control target key start
LH: loop header
LB: loop body
LE: loop exit
PB: predicated region body
PF: predicated region fallthrough
CT: control target
= control target key end

     0   :  { %7 = vsyncpa [#allocation5], 0  ;;  %s246_s0 = inlined_call_operand.hbm [shape: f32[4,128], index: 0, kind: input, shape index: {}]   ;;  %s247_s1 = inlined_call_operand.hbm [shape: f32[4,128], index: 1, kind: input, shape index: {}]   ;;  %s248_s2 = inlined_call_operand.hbm [shape: f32[1,1], index: 2, kind: output, shape index: {}]  }
   0x1   :  { %8 = vsyncpa [#allocation8], 0 }
   0x2   :  { %9 = vsyncpa [#allocation6], 0  ;;  %s191_s9 = smov [#allocation4]   ;;  %s192_s11 = smov [#allocation7]  }
   0x3   :  { %s16_s10 = sshll.u32 %s191_s9, 4  ;;  %s26_s12 = sshll.u32 %s192_s11, 4  ;;  %s17_s10 = int_to_ptr.vmem [resolvable:$true] %s16_s10  ;;  %s27_s12 = int_to_ptr.vmem [resolvable:$true] %s26_s12 }
   0x4   :  { %s119_s15 = scalar_lea.hbm %s246_s0, 64 }
   0x5   :  { %p120_p0 = scmp.ne.s32.totalorder %s246_s0, %s119_s15  ;;  %p123_p1 = scmp.lt.u32.totalorder %s119_s15, %s246_s0 }
   0x7   :  { %p125_p2 = pnand %p123_p1, %p120_p0 }
   0x9   :  { %128 = shalt.err (!%p125_p2)
}
   0xa   :  { %s129_s20 = scalar_lea.vmem %s17_s10, 64  ;;  %p134_p4 = scmp.lt.s32.totalorder %s17_s10, %s17_s10 }
   0xb   :  { %p130_p3 = scmp.ne.s32.totalorder %s17_s10, %s129_s20  ;;  %p135_p5 = scmp.lt.s32.totalorder %s129_s20, %s129_s20 }
   0xd   :  { %p136_p6 = por %p135_p5, %p134_p4 }
   0xf   :  { %p137_p7 = pnand %p136_p6, %p130_p3 }
  0x11   :  { %140 = shalt.err (!%p137_p7)
}
  0x12   :  { %19 = dma.hbm_to_vmem [thread:$0]  %s246_s0, 64, %s17_s10, [#allocation5]  }
  0x13   :  { %s141_s25 = scalar_lea.hbm %s247_s1, 64 }
  0x14   :  { %p142_p8 = scmp.ne.s32.totalorder %s247_s1, %s141_s25  ;;  %p145_p9 = scmp.lt.u32.totalorder %s141_s25, %s247_s1 }
  0x16   :  { %p147_p10 = pnand %p145_p9, %p142_p8 }
  0x18   :  { %150 = shalt.err (!%p147_p10)
}
  0x19   :  { %s151_s30 = scalar_lea.vmem %s27_s12, 64  ;;  %p156_p12 = scmp.lt.s32.totalorder %s27_s12, %s27_s12 }
  0x1a   :  { %p152_p11 = scmp.ne.s32.totalorder %s27_s12, %s151_s30  ;;  %p157_p13 = scmp.lt.s32.totalorder %s151_s30, %s151_s30 }
  0x1c   :  { %p158_p0 = por %p157_p13, %p156_p12 }
  0x1e   :  { %p159_p1 = pnand %p158_p0, %p152_p11 }
  0x20   :  { %162 = shalt.err (!%p159_p1)
}
  0x21   :  { %29 = dma.hbm_to_vmem [thread:$0]  %s247_s1, 64, %s27_s12, [#allocation8]  }
  0x22   :  { %185 = dma.done.wait [#allocation5], 64  }
  0x23   :  { %186 = vsyncadd [#allocation5], 4294967232 }
  0x24   :  { %187 = dma.done.wait [#allocation8], 64  }
  0x25   :  { %188 = vsyncadd [#allocation8], 4294967232  ;;  %v193_v0 = vmov 0.0   ;;  %v42_v1 = vld [vmem:[#allocation4] sm:$0xf]  ;;  %vm52_vm0 = vcmask 1043456  }
  0x26   :  { %40 = vst [vmem:[#allocation2] sm:$0x1] %v193_v0  ;;  %41 = vst [vmem:[#allocation3] sm:$0x1] %v193_v0  ;;  %v44_v2 = vsub.f32 0.0, %v42_v1  ;;  %vm77_vm1 = vcmask 1040384  }
  0x27   :  { %v43_v6 = vld [vmem:[#allocation7] sm:$0xf]  ;;  %s194_s1 = smov [#allocation9]   ;;  %vm91_vm2 = vcmask 0  }
  0x28   :  { %v45_v3 = vmul.f32 1.442695, %v44_v2  ;;  %s99_s4 = sshll.u32 %s194_s1, 4  ;;  %s100_s4 = int_to_ptr.vmem [resolvable:$true] %s99_s4 }
  0x29   :  { %s163_s5 = scalar_lea.vmem %s100_s4, 16  ;;  %s167_s6 = scalar_lea.vmem %s100_s4, 32 }
  0x2a   :  { %113 = vpow2.f32 %v45_v3  ;;  %p164_p2 = scmp.ne.s32.totalorder %s100_s4, %s163_s5  ;;  %p168_p3 = scmp.lt.s32.totalorder %s100_s4, %s100_s4 }
  0x2b   :  { %p169_p4 = scmp.lt.s32.totalorder %s167_s6, %s163_s5 }
  0x2d   :  { %v62_v22 = vld [vmem:[#allocation3] sm:$0x1]  ;;  %v50_v23 = vld [vmem:[#allocation2] sm:$0x1]  ;;  %p170_p5 = por %p169_p4, %p168_p3 }
  0x2f   :  { %p171_p6 = pnand %p170_p5, %p164_p2 }
  0x34   :  { %v114_v4 = vpop.eup %113 }
  0x35   :  { %v47_v5 = vadd.f32 1.0, %v114_v4 }
  0x37   :  { %115 = vrcp.f32 %v47_v5 }
  0x41   :  { %v116_v7 = vpop.eup %115 }
  0x42   :  { %v63_v8 = vadd.f32 %v116_v7, %v43_v6  ;;  %v51_v9 = vmul.f32 %v116_v7, %v43_v6 }
  0x44   :  { %v64_v10 = vsel %vm52_vm0, %v63_v8, 0.0  ;;  %v53_v11 = vsel %vm52_vm0, %v51_v9, 0.0 }
  0x45   :  { %v65_v12 = vrot.slane %v64_v10, 4  ;;  %v54_v13 = vrot.slane %v53_v11, 4 }
  0x47   :  { %v66_v14 = vadd.f32 %v65_v12, %v64_v10  ;;  %v55_v15 = vadd.f32 %v54_v13, %v53_v11 }
  0x49   :  { %v67_v16 = vrot.slane %v66_v14, 2  ;;  %v56_v17 = vrot.slane %v55_v15, 2 }
  0x4b   :  { %v68_v18 = vadd.f32 %v67_v16, %v66_v14  ;;  %v57_v19 = vadd.f32 %v56_v17, %v55_v15 }
  0x4d   :  { %v69_v20 = vrot.slane %v68_v18, 1  ;;  %v58_v21 = vrot.slane %v57_v19, 1 }
  0x4f   :  { %v70_v24 = vadd.f32 %v69_v20, %v68_v18  ;;  %v59_v25 = vadd.f32 %v58_v21, %v57_v19 }
  0x51   :  { %v71_v26 = vadd.f32 %v70_v24, %v62_v22  ;;  %v60_v27 = vadd.f32 %v59_v25, %v50_v23 }
  0x53   :  { %72 = vst [vmem:[#allocation3] sm:$0x1] %v71_v26  ;;  %61 = vst [vmem:[#allocation2] sm:$0x1] %v60_v27 }
  0x5a   :  { %v81_v28 = vld [vmem:[#allocation3] sm:$0x1]  ;;  %v76_v29 = vld [vmem:[#allocation2] sm:$0x1] }
  0x5b   :  { %v82_v30 = vsel %vm77_vm1, %v81_v28, 0.0  ;;  %v78_v31 = vsel %vm77_vm1, %v76_v29, 0.0 }
  0x5c   :  { %83 = vadd.xlane.f32.xlu0 %v82_v30 }
  0x60   :  { %79 = vadd.xlane.f32.xlu0 %v78_v31 }
  0xe9   :  { %v84_v32 = vpop.xlane.xlu0 %83 }
  0xea   :  { %v87_v33 = vadd.f32 1.0, %v84_v32 }
  0xec   :  { %117 = vrcp.f32 %v87_v33 }
  0xed   :  { %v80_v34 = vpop.xlane.xlu0 %79 }
  0xee   :  { %v85_v35 = vmul.f32 2.0, %v80_v34 }
  0xf0   :  { %v86_v36 = vadd.f32 1.0, %v85_v35 }
  0xf6   :  { %v118_v37 = vpop.eup %117 }
  0xf7   :  { %v89_v38 = vmul.f32 %v118_v37, %v86_v36 }
  0xf9   :  { %v90_v39 = vsub.f32 1.0, %v89_v38 }
  0xfb   :  { %92 = vst.msk [vmem:[#allocation9] sm:$0x1] %vm91_vm2, %v90_v39 }
  0xfc   :  { %174 = shalt.err (!%p171_p6)
}
  0xfd   :  { %s175_s9 = scalar_lea.hbm %s248_s2, 16 }
  0xfe   :  { %p176_p7 = scmp.ne.s32.totalorder %s248_s2, %s175_s9  ;;  %p179_p8 = scmp.lt.u32.totalorder %s175_s9, %s248_s2 }
 0x100   :  { %p181_p9 = pnand %p179_p8, %p176_p7 }
 0x102   :  { %184 = shalt.err (!%p181_p9)
}
 0x103   :  { %102 = dma.vmem_to_hbm [thread:$0]  %s100_s4, 16, %s248_s2, [#allocation6]  }
 0x104   :  { %189 = dma.done.wait [#allocation6], 16  }
 0x105   :  { %190 = vsyncadd [#allocation6], 4294967280 }
 0x106   :  { %106 = vsyncpa [#allocation5], 1 }
 0x107   :  { %107 = vsyncpa [#allocation8], 1 }
 0x108   :  { %108 = vsyncpa [#allocation6], 1 }

</bundles_post_ra>
